<compile_context>
chip_gen: v5e
topology: v5e:2x2
jax: 0.10.0
libtpu: 0.0.40
codegen_flags: <defaults>
</compile_context>

<pallas_src>
import jax
import jax.numpy as jnp
from jax.experimental import pallas as pl
from jax.experimental.pallas import tpu as pltpu

IN_FEATURES = 28 * 28   # 784 (full-K block; Mosaic handles the MXU K padding)
H1, H2 = 256, 128
N_OUT = 10
N_PAD = 128             # lane-dense output head
LATENCY_MAX_B = 128     # gridless single-call path for tiny batches
TM_MAX = 1024           # max rows per batch tile (per-tile VMEM ~ a few MiB)


def _round_up(v, m):
    return ((v + m - 1) // m) * m


def mnist_mlp_kernel(x_ref, w1_ref, b1_ref, w2_ref, b2_ref, w3_ref, b3_ref, o_ref):
    # In-kernel cast: x arrives f32 straight from HBM, cast to bf16 for the MXU.
    x = x_ref[...].astype(jnp.bfloat16)

    # Layer 1: Linear(784->256) + ReLU. bf16 MXU inputs, f32 accumulation.
    h1 = jnp.dot(x, w1_ref[...], preferred_element_type=jnp.float32)
    h1 = jnp.maximum(h1 + b1_ref[...], 0.0)

    # Layer 2: Linear(256->128) + ReLU.
    h2 = jnp.dot(h1.astype(jnp.bfloat16), w2_ref[...],
                 preferred_element_type=jnp.float32)
    h2 = jnp.maximum(h2 + b2_ref[...], 0.0)

    # Output head: Linear(128->10), N zero-padded to 128 lanes (unmasked stores).
    out = jnp.dot(h2.astype(jnp.bfloat16), w3_ref[...],
                  preferred_element_type=jnp.float32)
    o_ref[...] = (out + b3_ref[...]).astype(o_ref.dtype)


def init_params(key):
    """PyTorch nn.Linear default init: U(-1/sqrt(fan_in), 1/sqrt(fan_in)).
    Weights stored as (in_features, out_features), biases as (1, out_features), f32."""
    dims = [(IN_FEATURES, H1), (H1, H2), (H2, N_OUT)]
    params = []
    for fan_in, fan_out in dims:
        key, kw, kb = jax.random.split(key, 3)
        bound = 1.0 / jnp.sqrt(jnp.float32(fan_in))
        w = jax.random.uniform(kw, (fan_in, fan_out), jnp.float32, -bound, bound)
        b = jax.random.uniform(kb, (1, fan_out), jnp.float32, -bound, bound)
        params.extend([w, b])
    return tuple(params)


def prepare_params(params):
    """One-time weight prep: cast weights to bf16 (MXU inputs), zero-pad the output
    head's N (10->128). Biases stay f32 (bias+ReLU run in f32 on the VPU)."""
    w1, b1, w2, b2, w3, b3 = params
    w1p = w1.astype(jnp.bfloat16)                                   # (784, 256)
    w2p = w2.astype(jnp.bfloat16)                                   # (256, 128)
    w3p = jnp.pad(w3, ((0, 0), (0, N_PAD - N_OUT))).astype(jnp.bfloat16)  # (128, 128)
    b3p = jnp.pad(b3, ((0, 0), (0, N_PAD - N_OUT)))                 # (1, 128)
    return (w1p, b1, w2p, b2, w3p, b3p)


@jax.jit
def mnist_forward(x_nchw, kparams):
    """x_nchw: (B, 1, 28, 28) f32 (NCHW, like PyTorch). Returns (B, 10) f32 logits."""
    w1, b1, w2, b2, w3, b3 = kparams
    B = x_nchw.shape[0]
    x = x_nchw.reshape(B, IN_FEATURES)   # free; stays f32 — cast happens in-kernel

    if B <= LATENCY_MAX_B:
        # Latency path: single gridless fused call, full-array blocks in VMEM.
        full = lambda a: pl.BlockSpec(a.shape, lambda: (0,) * a.ndim,
                                      memory_space=pltpu.VMEM)
        out = pl.pallas_call(
            mnist_mlp_kernel,
            out_shape=jax.ShapeDtypeStruct((B, N_PAD), jnp.float32),
            in_specs=[full(x), full(w1), full(b1), full(w2), full(b2),
                      full(w3), full(b3)],
            out_specs=pl.BlockSpec((B, N_PAD), lambda: (0, 0),
                                   memory_space=pltpu.VMEM),
        )(x, w1, b1, w2, b2, w3, b3)
        return out[:, :N_OUT]

    # Throughput path: adaptive batch tiling.
    #  - even tile count >= 2 so both v7x TensorCores are busy (neutral on v5e/v6e)
    #  - tm rounded to a multiple of 16 (clean bf16 sublane packing), sized so
    #    ragged batches pad only up to n_tiles*16 rows (not up to a fixed 512).
    n_tiles = max(2, pl.cdiv(B, TM_MAX))
    if n_tiles % 2:
        n_tiles += 1
    tm = _round_up(pl.cdiv(B, n_tiles), 16)
    B_pad = n_tiles * tm
    if B_pad != B:
        x = jnp.pad(x, ((0, B_pad - B), (0, 0)))

    resident = lambda a: pl.BlockSpec(a.shape, lambda i: (0,) * a.ndim)
    out = pl.pallas_call(
        mnist_mlp_kernel,
        out_shape=jax.ShapeDtypeStruct((B_pad, N_PAD), jnp.float32),
        grid=(n_tiles,),
        in_specs=[
            pl.BlockSpec((tm, IN_FEATURES), lambda i: (i, 0)),   # x tile (f32)
            resident(w1), resident(b1),
            resident(w2), resident(b2),
            resident(w3), resident(b3),
        ],
        out_specs=pl.BlockSpec((tm, N_PAD), lambda i: (i, 0)),
        compiler_params=pltpu.CompilerParams(
            dimension_semantics=("parallel",)),
    )(x, w1, b1, w2, b2, w3, b3)
    return out[:B, :N_OUT]


def reference_forward(x_nchw, params):
    """Plain-JAX reference mirroring the kernel's bf16-input / f32-accumulate numerics."""
    w1, b1, w2, b2, w3, b3 = params
    q = lambda a: a.astype(jnp.bfloat16).astype(jnp.float32)
    x = q(x_nchw.reshape(x_nchw.shape[0], IN_FEATURES))
    h1 = jnp.maximum(x @ q(w1) + b1, 0.0)
    h2 = jnp.maximum(q(h1) @ q(w2) + b2, 0.0)
    return q(h2) @ q(w3) + b3


if __name__ == "__main__":
    key = jax.random.PRNGKey(0)
    key, kx1, kx2 = jax.random.split(key, 3)

    params = init_params(key)           # f32, PyTorch-layout (reference)
    kparams = prepare_params(params)    # bf16 / padded (kernel)

    # 1) Small-batch latency path (gridless fused call).
    x_small = jax.random.normal(kx1, (8, 1, 28, 28), jnp.float32)
    y_small = jax.block_until_ready(mnist_forward(x_small, kparams))
    assert y_small.shape == (8, N_OUT)
    ref_small = reference_forward(x_small, params)
    assert jnp.allclose(y_small, ref_small, atol=5e-2, rtol=5e-2)

    # 2) Batch-tiled throughput path (even grid >= 2 tiles, ragged tail padded to
    #    a multiple of 16 rows per tile: B=300 -> 2 tiles of 160 rows).
    x_big = jax.random.normal(kx2, (300, 1, 28, 28), jnp.float32)
    y_big = jax.block_until_ready(mnist_forward(x_big, kparams))
    assert y_big.shape == (300, N_OUT)
    ref_big = reference_forward(x_big, params)
    assert jnp.allclose(y_big, ref_big, atol=5e-2, rtol=5e-2)

    print("KERNEL_OK")
</pallas_src>

<mosaic_0001>
module attributes {stable_mosaic.version = 11 : i64} {
  func.func @mnist_mlp_kernel(%arg0: memref<8x784xf32, #tpu.memory_space<vmem>>, %arg1: memref<784x256xbf16, #tpu.memory_space<vmem>>, %arg2: memref<1x256xf32, #tpu.memory_space<vmem>>, %arg3: memref<256x128xbf16, #tpu.memory_space<vmem>>, %arg4: memref<1x128xf32, #tpu.memory_space<vmem>>, %arg5: memref<128x128xbf16, #tpu.memory_space<vmem>>, %arg6: memref<1x128xf32, #tpu.memory_space<vmem>>, %arg7: memref<8x128xf32, #tpu.memory_space<vmem>>) attributes {dimension_semantics = [], scalar_prefetch = 0 : i64, scratch_operands = 0 : i64, tpu.core_type = #tpu.core_type<tc>} {
    %c0 = arith.constant 0 : index
    %c0_0 = arith.constant 0 : index
    %0 = vector.load %arg0[%c0, %c0_0] : memref<8x784xf32, #tpu.memory_space<vmem>>, vector<8x784xf32>
    %1 = arith.truncf %0 : vector<8x784xf32> to vector<8x784xbf16>
    %c0_1 = arith.constant 0 : index
    %c0_2 = arith.constant 0 : index
    %2 = vector.load %arg1[%c0_1, %c0_2] : memref<784x256xbf16, #tpu.memory_space<vmem>>, vector<784x256xbf16>
    %cst = arith.constant dense<0.000000e+00> : vector<8x256xf32>
    %3 = tpu.matmul %1, %2, %cst {dimension_numbers = #tpu.dot_dimension_numbers<[1], [0], [0], [1], [0, 0, 1, 1], [], []>} : vector<8x784xbf16>, vector<784x256xbf16>, vector<8x256xf32> -> vector<8x256xf32>
    %c0_3 = arith.constant 0 : index
    %c0_4 = arith.constant 0 : index
    %4 = vector.load %arg2[%c0_3, %c0_4] : memref<1x256xf32, #tpu.memory_space<vmem>>, vector<1x256xf32>
    %5 = vector.broadcast %4 : vector<1x256xf32> to vector<8x256xf32>
    %6 = arith.addf %3, %5 : vector<8x256xf32>
    %cst_5 = arith.constant 0.000000e+00 : f32
    %7 = vector.broadcast %cst_5 : f32 to vector<8x256xf32>
    %8 = arith.maximumf %6, %7 : vector<8x256xf32>
    %9 = arith.truncf %8 : vector<8x256xf32> to vector<8x256xbf16>
    %c0_6 = arith.constant 0 : index
    %c0_7 = arith.constant 0 : index
    %10 = vector.load %arg3[%c0_6, %c0_7] : memref<256x128xbf16, #tpu.memory_space<vmem>>, vector<256x128xbf16>
    %cst_8 = arith.constant dense<0.000000e+00> : vector<8x128xf32>
    %11 = tpu.matmul %9, %10, %cst_8 {dimension_numbers = #tpu.dot_dimension_numbers<[1], [0], [0], [1], [0, 0, 1, 1], [], []>} : vector<8x256xbf16>, vector<256x128xbf16>, vector<8x128xf32> -> vector<8x128xf32>
    %c0_9 = arith.constant 0 : index
    %c0_10 = arith.constant 0 : index
    %12 = vector.load %arg4[%c0_9, %c0_10] : memref<1x128xf32, #tpu.memory_space<vmem>>, vector<1x128xf32>
    %13 = vector.broadcast %12 : vector<1x128xf32> to vector<8x128xf32>
    %14 = arith.addf %11, %13 : vector<8x128xf32>
    %cst_11 = arith.constant 0.000000e+00 : f32
    %15 = vector.broadcast %cst_11 : f32 to vector<8x128xf32>
    %16 = arith.maximumf %14, %15 : vector<8x128xf32>
    %17 = arith.truncf %16 : vector<8x128xf32> to vector<8x128xbf16>
    %c0_12 = arith.constant 0 : index
    %c0_13 = arith.constant 0 : index
    %18 = vector.load %arg5[%c0_12, %c0_13] : memref<128x128xbf16, #tpu.memory_space<vmem>>, vector<128x128xbf16>
    %cst_14 = arith.constant dense<0.000000e+00> : vector<8x128xf32>
    %19 = tpu.matmul %17, %18, %cst_14 {dimension_numbers = #tpu.dot_dimension_numbers<[1], [0], [0], [1], [0, 0, 1, 1], [], []>} : vector<8x128xbf16>, vector<128x128xbf16>, vector<8x128xf32> -> vector<8x128xf32>
    %c0_15 = arith.constant 0 : index
    %c0_16 = arith.constant 0 : index
    %20 = vector.load %arg6[%c0_15, %c0_16] : memref<1x128xf32, #tpu.memory_space<vmem>>, vector<1x128xf32>
    %21 = vector.broadcast %20 : vector<1x128xf32> to vector<8x128xf32>
    %22 = arith.addf %19, %21 : vector<8x128xf32>
    %c0_17 = arith.constant 0 : index
    %c0_18 = arith.constant 0 : index
    %23 = vector.load %arg7[%c0_17, %c0_18] : memref<8x128xf32, #tpu.memory_space<vmem>>, vector<8x128xf32>
    tpu.vector_store %arg7[%c0_17, %c0_18], %22 {strides = array<i32>} : memref<8x128xf32, #tpu.memory_space<vmem>>, vector<8x128xf32>,
    return
  }
}

</mosaic_0001>

<bundles_post_ra>
// kernel: mnist_forward.1
= control target key start
LH: loop header
LB: loop body
LE: loop exit
PB: predicated region body
PF: predicated region fallthrough
CT: control target
= control target key end

     0   :  { %12 = vsyncpa [#allocation3], 0  ;;  %s2517_s0 = inlined_call_operand.vmem [shape: f32[8,784], index: 0, kind: input, shape index: {}]   ;;  %s2518_s1 = inlined_call_operand.vmem [shape: bf16[784,256], index: 1, kind: input, shape index: {}]   ;;  %s2519_s2 = inlined_call_operand.vmem [shape: f32[1,256], index: 2, kind: input, shape index: {}]   ;;  %s2520_s3 = inlined_call_operand.hbm [shape: bf16[256,128], index: 3, kind: input, shape index: {}]   ;;  %s2521_s4 = inlined_call_operand.vmem [shape: f32[1,128], index: 4, kind: input, shape index: {}]   ;;  %s2522_s5 = inlined_call_operand.hbm [shape: bf16[128,128], index: 5, kind: input, shape index: {}]   ;;  %s2523_s6 = inlined_call_operand.vmem [shape: f32[1,128], index: 6, kind: input, shape index: {}]   ;;  %s2524_s7 = inlined_call_operand.hbm [shape: f32[8,128], index: 7, kind: output, shape index: {}]  }
   0x1   :  { %13 = vsyncpa [#allocation6], 0 }
   0x2   :  { %14 = vsyncpa [#allocation4], 0  ;;  %s25_s26 = sshll.u32 %s2520_s3, 4  ;;  %s1815_s27 = smov [#allocation2]   ;;  %s26_s26 = int_to_ptr.hbm [resolvable:$true] %s25_s26 }
   0x3   :  { %s27_s28 = sshll.u32 %s1815_s27, 4  ;;  %s40_s8 = sshll.u32 %s2522_s5, 4  ;;  %s28_s28 = int_to_ptr.vmem [resolvable:$true] %s27_s28  ;;  %s41_s8 = int_to_ptr.hbm [resolvable:$true] %s40_s8 }
   0x4   :  { %s1816_s9 = smov 64   ;;  %s1817_s10 = smov 4  }
   0x5   :  { %33 = dma.hbm_to_vmem [thread:$0]  %s26_s26, 2048, %s28_s28, [#allocation3], %s1816_s9, %s1816_s9, %s1817_s10  }
   0x6   :  { %s1818_s11 = smov [#allocation5]  }
   0x7   :  { %s42_s12 = sshll.u32 %s1818_s11, 4  ;;  %s43_s12 = int_to_ptr.vmem [resolvable:$true] %s42_s12 }
   0x8   :  { %48 = dma.hbm_to_vmem [thread:$0]  %s41_s8, 1024, %s43_s12, [#allocation6], %s1816_s9, %s1816_s9, %s1817_s10  }
   0x9   :  { %1809 = dma.done.wait [#allocation3], 2048  }
   0xa   :  { %1810 = vsyncadd [#allocation3], 4294965248 }
   0xb   :  { %1811 = dma.done.wait [#allocation6], 1024  }
   0xc   :  { %1812 = vsyncadd [#allocation6], 4294966272  ;;  %v1176_v0 = vld [vmem:[%s2518_s1 + $0x70] sm:$0xf]  ;;  %v1623_v1 = vld [vmem:[%s2518_s1 + $0x74] sm:$0xf0] }
   0xd   :  { %v1304_v2 = vld [vmem:[%s2518_s1 + $0x170] sm:$0xf]  ;;  %v1177_v3 = vor.u32 %v1623_v1, %v1176_v0  ;;  %v1655_v4 = vld [vmem:[%s2518_s1 + $0x174] sm:$0xf0]  ;;  %v1168_v11 = vld [vmem:[%s2518_s1 + $0x60] sm:$0xf] }
   0xe   :  { %v1368_v5 = vld [vmem:[%s2518_s1 + $0x1f0] sm:$0xf]  ;;  %v1671_v6 = vld [vmem:[%s2518_s1 + $0x1f4] sm:$0xf0]  ;;  %v1305_v7 = vor.u32 %v1655_v4, %v1304_v2  ;;  %v1621_v13 = vld [vmem:[%s2518_s1 + $0x64] sm:$0xf0] }
   0xf   :  { %v1369_v8 = vor.u32 %v1671_v6, %v1368_v5  ;;  %v1240_v9 = vld [vmem:[%s2518_s1 + $0xf0] sm:$0xf]  ;;  %v1639_v10 = vld [vmem:[%s2518_s1 + $0xf4] sm:$0xf0]  ;;  %672 = vmatpush.bf16.msra.mxu0 %v1177_v3  ;;  %v1296_v14 = vld [vmem:[%s2518_s1 + $0x160] sm:$0xf]  ;;  %v1169_v16 = vor.u32 %v1621_v13, %v1168_v11 }
  0x10   :  { %v1241_v12 = vor.u32 %v1639_v10, %v1240_v9  ;;  %v1653_v15 = vld [vmem:[%s2518_s1 + $0x164] sm:$0xf0]  ;;  %698 = vmatpush.bf16.msra.mxu2 %v1305_v7  ;;  %v1360_v18 = vld [vmem:[%s2518_s1 + $0x1e0] sm:$0xf]  ;;  %v1160_v23 = vld [vmem:[%s2518_s1 + $0x50] sm:$0xf] }
  0x11   :  { %711 = vmatpush.bf16.msra.mxu3 %v1369_v8  ;;  %v1297_v17 = vor.u32 %v1653_v15, %v1296_v14  ;;  %v1669_v19 = vld [vmem:[%s2518_s1 + $0x1e4] sm:$0xf0]  ;;  %v1232_v20 = vld [vmem:[%s2518_s1 + $0xe0] sm:$0xf]  ;;  %v1619_v24 = vld [vmem:[%s2518_s1 + $0x54] sm:$0xf0] }
  0x12   :  { %685 = vmatpush.bf16.msra.mxu1 %v1241_v12  ;;  %v1361_v21 = vor.u32 %v1669_v19, %v1360_v18  ;;  %v1637_v22 = vld [vmem:[%s2518_s1 + $0xe4] sm:$0xf0]  ;;  %v1288_v26 = vld [vmem:[%s2518_s1 + $0x150] sm:$0xf]  ;;  %v1651_v27 = vld [vmem:[%s2518_s1 + $0x154] sm:$0xf0]  ;;  %v1161_v29 = vor.u32 %v1619_v24, %v1160_v23 }
  0x13   :  { %v1233_v25 = vor.u32 %v1637_v22, %v1232_v20  ;;  %v1352_v28 = vld [vmem:[%s2518_s1 + $0x1d0] sm:$0xf]  ;;  %673 = vmatpush.bf16.msra.mxu0 %v1169_v16  ;;  %v1667_v30 = vld [vmem:[%s2518_s1 + $0x1d4] sm:$0xf0]  ;;  %v1289_v33 = vor.u32 %v1651_v27, %v1288_v26  ;;  %v1152_v35 = vld [vmem:[%s2518_s1 + $0x40] sm:$0xf] }
  0x14   :  { %v1224_v31 = vld [vmem:[%s2518_s1 + $0xd0] sm:$0xf]  ;;  %v1635_v32 = vld [vmem:[%s2518_s1 + $0xd4] sm:$0xf0]  ;;  %699 = vmatpush.bf16.msra.mxu2 %v1297_v17  ;;  %v1353_v34 = vor.u32 %v1667_v30, %v1352_v28  ;;  %v1617_v36 = vld [vmem:[%s2518_s1 + $0x44] sm:$0xf0] }
  0x15   :  { %712 = vmatpush.bf16.msra.mxu3 %v1361_v21  ;;  %v1280_v37 = vld [vmem:[%s2518_s1 + $0x140] sm:$0xf]  ;;  %v1225_v38 = vor.u32 %v1635_v32, %v1224_v31  ;;  %v1649_v39 = vld [vmem:[%s2518_s1 + $0x144] sm:$0xf0]  ;;  %v1153_v44 = vor.u32 %v1617_v36, %v1152_v35  ;;  %v1144_v47 = vld [vmem:[%s2518_s1 + $0x30] sm:$0xf] }
  0x16   :  { %686 = vmatpush.bf16.msra.mxu1 %v1233_v25  ;;  %v1344_v40 = vld [vmem:[%s2518_s1 + $0x1c0] sm:$0xf]  ;;  %v1665_v41 = vld [vmem:[%s2518_s1 + $0x1c4] sm:$0xf0]  ;;  %v1281_v45 = vor.u32 %v1649_v39, %v1280_v37  ;;  %v1615_v48 = vld [vmem:[%s2518_s1 + $0x34] sm:$0xf0] }
  0x17   :  { %v1216_v42 = vld [vmem:[%s2518_s1 + $0xc0] sm:$0xf]  ;;  %v1633_v43 = vld [vmem:[%s2518_s1 + $0xc4] sm:$0xf0]  ;;  %674 = vmatpush.bf16.msra.mxu0 %v1161_v29  ;;  %v1345_v46 = vor.u32 %v1665_v41, %v1344_v40  ;;  %v1272_v49 = vld [vmem:[%s2518_s1 + $0x130] sm:$0xf]  ;;  %v1145_v56 = vor.u32 %v1615_v48, %v1144_v47 }
  0x18   :  { %700 = vmatpush.bf16.msra.mxu2 %v1289_v33  ;;  %v1217_v50 = vor.u32 %v1633_v43, %v1216_v42  ;;  %v1647_v51 = vld [vmem:[%s2518_s1 + $0x134] sm:$0xf0]  ;;  %v1336_v52 = vld [vmem:[%s2518_s1 + $0x1b0] sm:$0xf]  ;;  %v1136_v59 = vld [vmem:[%s2518_s1 + $0x20] sm:$0xf] }
  0x19   :  { %713 = vmatpush.bf16.msra.mxu3 %v1353_v34  ;;  %v1663_v53 = vld [vmem:[%s2518_s1 + $0x1b4] sm:$0xf0]  ;;  %v1208_v54 = vld [vmem:[%s2518_s1 + $0xb0] sm:$0xf]  ;;  %v1273_v57 = vor.u32 %v1647_v51, %v1272_v49  ;;  %v1613_v60 = vld [vmem:[%s2518_s1 + $0x24] sm:$0xf0] }
  0x1a   :  { %687 = vmatpush.bf16.msra.mxu1 %v1225_v38  ;;  %v1631_v55 = vld [vmem:[%s2518_s1 + $0xb4] sm:$0xf0]  ;;  %v1337_v58 = vor.u32 %v1663_v53, %v1336_v52  ;;  %v1264_v61 = vld [vmem:[%s2518_s1 + $0x120] sm:$0xf]  ;;  %v1645_v63 = vld [vmem:[%s2518_s1 + $0x124] sm:$0xf0]  ;;  %v1137_v4 = vor.u32 %v1613_v60, %v1136_v59 }
  0x1b   :  { %675 = vmatpush.bf16.msra.mxu0 %v1153_v44  ;;  %v1209_v62 = vor.u32 %v1631_v55, %v1208_v54  ;;  %v1328_v0 = vld [vmem:[%s2518_s1 + $0x1a0] sm:$0xf]  ;;  %v1661_v1 = vld [vmem:[%s2518_s1 + $0x1a4] sm:$0xf0]  ;;  %v1265_v5 = vor.u32 %v1645_v63, %v1264_v61  ;;  %v1128_v7 = vld [vmem:[%s2518_s1 + $0x10] sm:$0xf] }
  0x1c   :  { %701 = vmatpush.bf16.msra.mxu2 %v1281_v45  ;;  %v1200_v2 = vld [vmem:[%s2518_s1 + $0xa0] sm:$0xf]  ;;  %v1629_v3 = vld [vmem:[%s2518_s1 + $0xa4] sm:$0xf0]  ;;  %v1329_v6 = vor.u32 %v1661_v1, %v1328_v0  ;;  %v1611_v8 = vld [vmem:[%s2518_s1 + $0x14] sm:$0xf0] }
  0x1d   :  { %714 = vmatpush.bf16.msra.mxu3 %v1345_v46  ;;  %v1256_v9 = vld [vmem:[%s2518_s1 + $0x110] sm:$0xf]  ;;  %v1201_v10 = vor.u32 %v1629_v3, %v1200_v2  ;;  %v1643_v11 = vld [vmem:[%s2518_s1 + $0x114] sm:$0xf0]  ;;  %v1129_v16 = vor.u32 %v1611_v8, %v1128_v7  ;;  %v1120_v17 = vld [vmem:[%s2518_s1] sm:$0xf] }
  0x1e   :  { %688 = vmatpush.bf16.msra.mxu1 %v1217_v50  ;;  %v1320_v12 = vld [vmem:[%s2518_s1 + $0x190] sm:$0xf]  ;;  %v1659_v13 = vld [vmem:[%s2518_s1 + $0x194] sm:$0xf0]  ;;  %v1609_v18 = vld [vmem:[%s2518_s1 + $0x4] sm:$0xf0]  ;;  %v1257_v20 = vor.u32 %v1643_v11, %v1256_v9 }
  0x1f   :  { %676 = vmatpush.bf16.msra.mxu0 %v1145_v56  ;;  %v1192_v14 = vld [vmem:[%s2518_s1 + $0x90] sm:$0xf]  ;;  %v1627_v15 = vld [vmem:[%s2518_s1 + $0x94] sm:$0xf0]  ;;  %v1248_v19 = vld [vmem:[%s2518_s1 + $0x100] sm:$0xf]  ;;  %v1321_v21 = vor.u32 %v1659_v13, %v1320_v12  ;;  %v1121_v32 = vor.u32 %v1609_v18, %v1120_v17 }
  0x20   :  { %702 = vmatpush.bf16.msra.mxu2 %v1273_v57  ;;  %v1641_v22 = vld [vmem:[%s2518_s1 + $0x104] sm:$0xf0]  ;;  %v1312_v23 = vld [vmem:[%s2518_s1 + $0x180] sm:$0xf]  ;;  %v1193_v25 = vor.u32 %v1627_v15, %v1192_v14  ;;  %v1432_v26 = vld [vmem:[%s2518_s1 + $0x270] sm:$0xf] }
  0x21   :  { %715 = vmatpush.bf16.msra.mxu3 %v1337_v58  ;;  %v1657_v24 = vld [vmem:[%s2518_s1 + $0x184] sm:$0xf0]  ;;  %v1687_v27 = vld [vmem:[%s2518_s1 + $0x274] sm:$0xf0]  ;;  %v1622_v28 = vld [vmem:[%s2518_s1 + $0x74] sm:$0xf]  ;;  %v1249_v36 = vor.u32 %v1641_v22, %v1248_v19 }
  0x22   :  { %689 = vmatpush.bf16.msra.mxu1 %v1209_v62  ;;  %v1178_v29 = vld [vmem:[%s2518_s1 + $0x78] sm:$0xf0]  ;;  %v1184_v30 = vld [vmem:[%s2518_s1 + $0x80] sm:$0xf]  ;;  %v1625_v31 = vld [vmem:[%s2518_s1 + $0x84] sm:$0xf0]  ;;  %v1313_v37 = vor.u32 %v1657_v24, %v1312_v23  ;;  %v1433_v41 = vor.u32 %v1687_v27, %v1432_v26 }
  0x23   :  { %677 = vmatpush.bf16.msra.mxu0 %v1137_v4  ;;  %v62_v33 = vld [vmem:[%s2517_s0 + $0x10] sm:$0xff]  ;;  %v1504_v34 = vld [vmem:[%s2518_s1 + $0x300] sm:$0xf]  ;;  %v1705_v35 = vld [vmem:[%s2518_s1 + $0x304] sm:$0xf0]  ;;  %v1181_v42 = vor.u32 %v1622_v28, %v1178_v29  ;;  %v1185_v46 = vor.u32 %v1625_v31, %v1184_v30  ;;  %vm668_vm0 = vcmask 130048  }
  0x24   :  { %703 = vmatpush.bf16.msra.mxu2 %v1265_v5  ;;  %v1496_v38 = vld [vmem:[%s2518_s1 + $0x2f0] sm:$0xf]  ;;  %v1703_v39 = vld [vmem:[%s2518_s1 + $0x2f4] sm:$0xf0]  ;;  %v1638_v40 = vld [vmem:[%s2518_s1 + $0xf4] sm:$0xf]  ;;  %v1505_v47 = vor.u32 %v1705_v35, %v1504_v34  ;;  %v2106_v51 = vpack.c.bf16 %v62_v33, %v62_v33 }
  0x25   :  { %716 = vmatpush.bf16.msra.mxu3 %v1329_v6  ;;  %v1242_v43 = vld [vmem:[%s2518_s1 + $0xf8] sm:$0xf0]  ;;  %v1424_v44 = vld [vmem:[%s2518_s1 + $0x260] sm:$0xf]  ;;  %v1685_v48 = vld [vmem:[%s2518_s1 + $0x264] sm:$0xf0]  ;;  %v1497_v52 = vor.u32 %v1703_v39, %v1496_v38 }
  0x26   :  { %690 = vmatpush.bf16.msra.mxu1 %v1201_v10  ;;  %v60_v45 = vld [vmem:[%s2517_s0] sm:$0xff]  ;;  %v1170_v50 = vld [vmem:[%s2518_s1 + $0x68] sm:$0xf0]  ;;  %v63_v53 = vld [vmem:[%s2517_s0 + $0x18] sm:$0xff]  ;;  %v1245_v55 = vor.u32 %v1638_v40, %v1242_v43  ;;  %v1425_v59 = vor.u32 %v1685_v48, %v1424_v44  ;;  %s1819_s16 = smov [#allocation7]   ;;  %s1107_s20 = sshll.u32 %s2524_s7, 4  ;;  %s1108_s20 = int_to_ptr.hbm [resolvable:$true] %s1107_s20 }
  0x27   :  { %678 = vmatpush.bf16.msra.mxu0 %v1129_v16  ;;  %v1620_v49 = vld [vmem:[%s2518_s1 + $0x64] sm:$0xf]  ;;  %v61_v54 = vld [vmem:[%s2517_s0 + $0x8] sm:$0xff]  ;;  %v2114_v56 = vpack.c.bf16 %v60_v45, %v60_v45  ;;  %v1488_v57 = vld [vmem:[%s2518_s1 + $0x2e0] sm:$0xf]  ;;  %v2131_v0 = vpack.c.bf16 %v63_v53, %v63_v53  ;;  %s1105_s17 = sshll.u32 %s1819_s16, 4  ;;  %s1106_s17 = int_to_ptr.vmem [resolvable:$true] %s1105_s17 }
  0x28   :  { %704 = vmatpush.bf16.msra.mxu2 %v1257_v20  ;;  %v1701_v58 = vld [vmem:[%s2518_s1 + $0x2e4] sm:$0xf0]  ;;  %v1173_v60 = vor.u32 %v1620_v49, %v1170_v50  ;;  %v1636_v61 = vld [vmem:[%s2518_s1 + $0xe4] sm:$0xf]  ;;  %v1234_v62 = vld [vmem:[%s2518_s1 + $0xe8] sm:$0xf0]  ;;  %v2133_v1 = vpack.c.bf16 %v61_v54, %v61_v54 }
  0x29   :  { %717 = vmatpush.bf16.msra.mxu3 %v1321_v21  ;;  %v1416_v63 = vld [vmem:[%s2518_s1 + $0x250] sm:$0xf]  ;;  %v1683_v2 = vld [vmem:[%s2518_s1 + $0x254] sm:$0xf0]  ;;  %v1618_v3 = vld [vmem:[%s2518_s1 + $0x54] sm:$0xf]  ;;  %v1489_v5 = vor.u32 %v1701_v58, %v1488_v57  ;;  %v1237_v6 = vor.u32 %v1636_v61, %v1234_v62 }
  0x2a   :  { %691 = vmatpush.bf16.msra.mxu1 %v1193_v25  ;;  %v1162_v4 = vld [vmem:[%s2518_s1 + $0x58] sm:$0xf0]  ;;  %v1480_v7 = vld [vmem:[%s2518_s1 + $0x2d0] sm:$0xf]  ;;  %v1699_v8 = vld [vmem:[%s2518_s1 + $0x2d4] sm:$0xf0]  ;;  %v1417_v9 = vor.u32 %v1683_v2, %v1416_v63 }
  0x2b   :  { %679 = vmatpush.bf16.msra.mxu0 %v1121_v32  ;;  %v1165_v10 = vor.u32 %v1618_v3, %v1162_v4  ;;  %v1634_v11 = vld [vmem:[%s2518_s1 + $0xd4] sm:$0xf]  ;;  %v1226_v12 = vld [vmem:[%s2518_s1 + $0xd8] sm:$0xf0]  ;;  %v1408_v13 = vld [vmem:[%s2518_s1 + $0x240] sm:$0xf]  ;;  %v1481_v17 = vor.u32 %v1699_v8, %v1480_v7 }
  0x2c   :  { %705 = vmatpush.bf16.msra.mxu2 %v1249_v36  ;;  %v1681_v14 = vld [vmem:[%s2518_s1 + $0x244] sm:$0xf0]  ;;  %v1616_v15 = vld [vmem:[%s2518_s1 + $0x44] sm:$0xf]  ;;  %v1154_v16 = vld [vmem:[%s2518_s1 + $0x48] sm:$0xf0]  ;;  %v1229_v18 = vor.u32 %v1634_v11, %v1226_v12 }
  0x2d   :  { %718 = vmatpush.bf16.msra.mxu3 %v1313_v37  ;;  %v1472_v19 = vld [vmem:[%s2518_s1 + $0x2c0] sm:$0xf]  ;;  %v1697_v20 = vld [vmem:[%s2518_s1 + $0x2c4] sm:$0xf0]  ;;  %v1409_v21 = vor.u32 %v1681_v14, %v1408_v13  ;;  %v1157_v22 = vor.u32 %v1616_v15, %v1154_v16  ;;  %v1632_v23 = vld [vmem:[%s2518_s1 + $0xc4] sm:$0xf] }
  0x2e   :  { %692 = vmatpush.bf16.msra.mxu1 %v1185_v46  ;;  %680 = vmatmul.bf16.vlgmr.msra.gmra.mxu0 %v2114_v56  ;;  %v1218_v24 = vld [vmem:[%s2518_s1 + $0xc8] sm:$0xf0]  ;;  %v1400_v25 = vld [vmem:[%s2518_s1 + $0x230] sm:$0xf]  ;;  %v1679_v26 = vld [vmem:[%s2518_s1 + $0x234] sm:$0xf0]  ;;  %v1473_v29 = vor.u32 %v1697_v20, %v1472_v19 }
  0x2f   :  { %724 = vmatpush.bf16.msrb.mxu0 %v1433_v41  ;;  %706 = vmatmul.bf16.vlgmr.msra.gmra.mxu2 %v2106_v51  ;;  %v1614_v27 = vld [vmem:[%s2518_s1 + $0x34] sm:$0xf]  ;;  %v1146_v28 = vld [vmem:[%s2518_s1 + $0x38] sm:$0xf0]  ;;  %v1221_v30 = vor.u32 %v1632_v23, %v1218_v24  ;;  %v1464_v31 = vld [vmem:[%s2518_s1 + $0x2b0] sm:$0xf]  ;;  %v1401_v34 = vor.u32 %v1679_v26, %v1400_v25 }
  0x30   :  { %757 = vmatpush.bf16.msrb.mxu2 %v1505_v47  ;;  %719 = vmatmul.bf16.vlgmr.msra.gmra.mxu3 %v2131_v0  ;;  %v1695_v32 = vld [vmem:[%s2518_s1 + $0x2b4] sm:$0xf0]  ;;  %v66_v33 = vld [vmem:[%s2517_s0 + $0x30] sm:$0xff]  ;;  %v1149_v35 = vor.u32 %v1614_v27, %v1146_v28  ;;  %v1210_v37 = vld [vmem:[%s2518_s1 + $0xb8] sm:$0xf0] }
  0x31   :  { %763 = vmatpush.bf16.msrb.mxu3 %v1181_v42  ;;  %693 = vmatmul.bf16.vlgmr.msra.gmra.mxu1 %v2133_v1  ;;  %v1630_v36 = vld [vmem:[%s2518_s1 + $0xb4] sm:$0xf]  ;;  %v1392_v38 = vld [vmem:[%s2518_s1 + $0x220] sm:$0xf]  ;;  %v1677_v39 = vld [vmem:[%s2518_s1 + $0x224] sm:$0xf0]  ;;  %v1465_v42 = vor.u32 %v1695_v32, %v1464_v31  ;;  %v2223_v43 = vpack.c.bf16 %v66_v33, %v66_v33 }
  0x32   :  { %737 = vmatpush.bf16.msrb.mxu1 %v1497_v52  ;;  %v1612_v40 = vld [vmem:[%s2518_s1 + $0x24] sm:$0xf]  ;;  %v1138_v41 = vld [vmem:[%s2518_s1 + $0x28] sm:$0xf0]  ;;  %v1213_v44 = vor.u32 %v1630_v36, %v1210_v37  ;;  %v1456_v45 = vld [vmem:[%s2518_s1 + $0x2a0] sm:$0xf]  ;;  %v1393_v47 = vor.u32 %v1677_v39, %v1392_v38 }
  0x33   :  { %725 = vmatpush.bf16.msrb.mxu0 %v1425_v59  ;;  %v1693_v46 = vld [vmem:[%s2518_s1 + $0x2a4] sm:$0xf0]  ;;  %v1141_v48 = vor.u32 %v1612_v40, %v1138_v41  ;;  %v1628_v49 = vld [vmem:[%s2518_s1 + $0xa4] sm:$0xf]  ;;  %v1202_v50 = vld [vmem:[%s2518_s1 + $0xa8] sm:$0xf0] }
  0x34   :  { %776 = vmatpush.bf16.msra.mxu2 %v1245_v55  ;;  %v1384_v52 = vld [vmem:[%s2518_s1 + $0x210] sm:$0xf]  ;;  %v1675_v53 = vld [vmem:[%s2518_s1 + $0x214] sm:$0xf0]  ;;  %v1610_v54 = vld [vmem:[%s2518_s1 + $0x14] sm:$0xf]  ;;  %v1457_v57 = vor.u32 %v1693_v46, %v1456_v45  ;;  %v1205_v58 = vor.u32 %v1628_v49, %v1202_v50 }
  0x35   :  { %764 = vmatpush.bf16.msrb.mxu3 %v1173_v60  ;;  %v1130_v55 = vld [vmem:[%s2518_s1 + $0x18] sm:$0xf0]  ;;  %v1448_v59 = vld [vmem:[%s2518_s1 + $0x290] sm:$0xf]  ;;  %v1691_v60 = vld [vmem:[%s2518_s1 + $0x294] sm:$0xf0]  ;;  %v1385_v62 = vor.u32 %v1675_v53, %v1384_v52 }
  0x36   :  { %738 = vmatpush.bf16.msrb.mxu1 %v1489_v5  ;;  %v1626_v61 = vld [vmem:[%s2518_s1 + $0x94] sm:$0xf]  ;;  %v1133_v63 = vor.u32 %v1610_v54, %v1130_v55  ;;  %v1194_v2 = vld [vmem:[%s2518_s1 + $0x98] sm:$0xf0]  ;;  %v1376_v3 = vld [vmem:[%s2518_s1 + $0x200] sm:$0xf]  ;;  %v1449_v8 = vor.u32 %v1691_v60, %v1448_v59 }
  0x37   :  { %726 = vmatpush.bf16.msrb.mxu0 %v1417_v9  ;;  %v1673_v4 = vld [vmem:[%s2518_s1 + $0x204] sm:$0xf0]  ;;  %v1608_v5 = vld [vmem:[%s2518_s1 + $0x4] sm:$0xf]  ;;  %v1654_v7 = vld [vmem:[%s2518_s1 + $0x174] sm:$0xf]  ;;  %v1197_v12 = vor.u32 %v1626_v61, %v1194_v2 }
  0x38   :  { %777 = vmatpush.bf16.msra.mxu2 %v1237_v6  ;;  %v1122_v6 = vld [vmem:[%s2518_s1 + $0x8] sm:$0xf0]  ;;  %v1306_v9 = vld [vmem:[%s2518_s1 + $0x178] sm:$0xf0]  ;;  %v1440_v13 = vld [vmem:[%s2518_s1 + $0x280] sm:$0xf]  ;;  %v1377_v16 = vor.u32 %v1673_v4, %v1376_v3 }
  0x39   :  { %765 = vmatpush.bf16.msrb.mxu3 %v1165_v10  ;;  %v1686_v10 = vld [vmem:[%s2518_s1 + $0x274] sm:$0xf]  ;;  %v1434_v11 = vld [vmem:[%s2518_s1 + $0x278] sm:$0xf0]  ;;  %v1689_v14 = vld [vmem:[%s2518_s1 + $0x284] sm:$0xf0] }
  0x3a   :  { %739 = vmatpush.bf16.msrb.mxu1 %v1481_v17  ;;  %v64_v15 = vld [vmem:[%s2517_s0 + $0x20] sm:$0xff]  ;;  %v1125_v17 = vor.u32 %v1608_v5, %v1122_v6  ;;  %v1186_v19 = vld [vmem:[%s2518_s1 + $0x88] sm:$0xf0]  ;;  %v1670_v20 = vld [vmem:[%s2518_s1 + $0x1f4] sm:$0xf]  ;;  %v1441_v26 = vor.u32 %v1689_v14, %v1440_v13 }
  0x3b   :  { %727 = vmatpush.bf16.msrb.mxu0 %v1409_v21  ;;  %v1309_v21 = vor.u32 %v1654_v7, %v1306_v9  ;;  %v1370_v23 = vld [vmem:[%s2518_s1 + $0x1f8] sm:$0xf0]  ;;  %v1702_v24 = vld [vmem:[%s2518_s1 + $0x2f4] sm:$0xf]  ;;  %v65_v27 = vld [vmem:[%s2517_s0 + $0x28] sm:$0xff] }
  0x3c   :  { %778 = vmatpush.bf16.msra.mxu2 %v1229_v18  ;;  %v1624_v18 = vld [vmem:[%s2518_s1 + $0x84] sm:$0xf]  ;;  %v1498_v25 = vld [vmem:[%s2518_s1 + $0x2f8] sm:$0xf0]  ;;  %v1426_v33 = vld [vmem:[%s2518_s1 + $0x268] sm:$0xf0]  ;;  %v2334_v37 = vpack.c.bf16 %v65_v27, %v65_v27 }
  0x3d   :  { %766 = vmatpush.bf16.msrb.mxu3 %v1157_v22  ;;  %v1437_v22 = vor.u32 %v1686_v10, %v1434_v11  ;;  %v1652_v28 = vld [vmem:[%s2518_s1 + $0x164] sm:$0xf]  ;;  %v1189_v31 = vor.u32 %v1624_v18, %v1186_v19  ;;  %v1362_v39 = vld [vmem:[%s2518_s1 + $0x1e8] sm:$0xf0]  ;;  %v1290_v45 = vld [vmem:[%s2518_s1 + $0x158] sm:$0xf0] }
  0x3e   :  { %740 = vmatpush.bf16.msrb.mxu1 %v1473_v29  ;;  %v1298_v29 = vld [vmem:[%s2518_s1 + $0x168] sm:$0xf0]  ;;  %v1684_v32 = vld [vmem:[%s2518_s1 + $0x264] sm:$0xf]  ;;  %v1682_v46 = vld [vmem:[%s2518_s1 + $0x254] sm:$0xf] }
  0x3f   :  { %728 = vmatpush.bf16.msrb.mxu0 %v1401_v34  ;;  %1510 = vmatmul.msk.bf16.vlgmr.msrb.gmra.mxu2 %vm668_vm0, %v2223_v43  ;;  %v1373_v34 = vor.u32 %v1670_v20, %v1370_v23  ;;  %v1668_v36 = vld [vmem:[%s2518_s1 + $0x1e4] sm:$0xf]  ;;  %v1301_v38 = vor.u32 %v1652_v28, %v1298_v29  ;;  %v1490_v41 = vld [vmem:[%s2518_s1 + $0x2e8] sm:$0xf0]  ;;  %v1666_v50 = vld [vmem:[%s2518_s1 + $0x1d4] sm:$0xf] }
  0x40   :  { %779 = vmatpush.bf16.msra.mxu2 %v1221_v30  ;;  %v2323_v30 = vpack.c.bf16 %v64_v15, %v64_v15  ;;  %v1700_v40 = vld [vmem:[%s2518_s1 + $0x2e4] sm:$0xf]  ;;  %v1354_v53 = vld [vmem:[%s2518_s1 + $0x1d8] sm:$0xf0]  ;;  %v1698_v54 = vld [vmem:[%s2518_s1 + $0x2d4] sm:$0xf] }
  0x41   :  { %767 = vmatpush.bf16.msrb.mxu3 %v1149_v35  ;;  %v1501_v35 = vor.u32 %v1702_v24, %v1498_v25  ;;  %v1493_v49 = vor.u32 %v1700_v40, %v1490_v41  ;;  %v1482_v55 = vld [vmem:[%s2518_s1 + $0x2d8] sm:$0xf0]  ;;  %v1282_v59 = vld [vmem:[%s2518_s1 + $0x148] sm:$0xf0]  ;;  %v1680_v60 = vld [vmem:[%s2518_s1 + $0x244] sm:$0xf] }
  0x42   :  { %741 = vmatpush.bf16.msrb.mxu1 %v1465_v42  ;;  %v1429_v42 = vor.u32 %v1684_v32, %v1426_v33  ;;  %v1410_v61 = vld [vmem:[%s2518_s1 + $0x248] sm:$0xf0]  ;;  %v1696_v4 = vld [vmem:[%s2518_s1 + $0x2c4] sm:$0xf]  ;;  %v1646_v6 = vld [vmem:[%s2518_s1 + $0x134] sm:$0xf] }
  0x43   :  { %729 = vmatpush.bf16.msrb.mxu0 %v1393_v47  ;;  %v1418_v47 = vld [vmem:[%s2518_s1 + $0x258] sm:$0xf0]  ;;  %v1346_v3 = vld [vmem:[%s2518_s1 + $0x1c8] sm:$0xf0]  ;;  %v1413_v5 = vor.u32 %v1680_v60, %v1410_v61  ;;  %v1694_v15 = vld [vmem:[%s2518_s1 + $0x2b4] sm:$0xf] }
  0x44   :  { %780 = vmatpush.bf16.msra.mxu2 %v1213_v44  ;;  %v1650_v44 = vld [vmem:[%s2518_s1 + $0x154] sm:$0xf]  ;;  %v1274_v7 = vld [vmem:[%s2518_s1 + $0x138] sm:$0xf0]  ;;  %v1644_v18 = vld [vmem:[%s2518_s1 + $0x124] sm:$0xf] }
  0x45   :  { %768 = vmatpush.bf16.msrb.mxu3 %v1141_v48  ;;  %v1365_v48 = vor.u32 %v1668_v36, %v1362_v39  ;;  %v1293_v52 = vor.u32 %v1650_v44, %v1290_v45  ;;  %v1402_v9 = vld [vmem:[%s2518_s1 + $0x238] sm:$0xf0]  ;;  %v1277_v13 = vor.u32 %v1646_v6, %v1274_v7  ;;  %v1266_v19 = vld [vmem:[%s2518_s1 + $0x128] sm:$0xf0]  ;;  %v1676_v20 = vld [vmem:[%s2518_s1 + $0x224] sm:$0xf] }
  0x46   :  { %742 = vmatpush.bf16.msrb.mxu1 %v1457_v57  ;;  %v1421_v57 = vor.u32 %v1682_v46, %v1418_v47  ;;  %v1338_v14 = vld [vmem:[%s2518_s1 + $0x1b8] sm:$0xf0]  ;;  %v1660_v24 = vld [vmem:[%s2518_s1 + $0x1a4] sm:$0xf]  ;;  %v1269_v25 = vor.u32 %v1644_v18, %v1266_v19  ;;  %v1458_v28 = vld [vmem:[%s2518_s1 + $0x2a8] sm:$0xf0] }
  0x47   :  { %730 = vmatpush.bf16.msrb.mxu0 %v1385_v62  ;;  %v1485_v62 = vor.u32 %v1698_v54, %v1482_v55  ;;  %v1692_v27 = vld [vmem:[%s2518_s1 + $0x2a4] sm:$0xf]  ;;  %v1258_v32 = vld [vmem:[%s2518_s1 + $0x118] sm:$0xf0]  ;;  %v1674_v33 = vld [vmem:[%s2518_s1 + $0x214] sm:$0xf] }
  0x48   :  { %781 = vmatpush.bf16.msra.mxu2 %v1205_v58  ;;  %v1648_v58 = vld [vmem:[%s2518_s1 + $0x144] sm:$0xf]  ;;  %v1461_v36 = vor.u32 %v1692_v27, %v1458_v28  ;;  %v1322_v40 = vld [vmem:[%s2518_s1 + $0x198] sm:$0xf0]  ;;  %v1690_v41 = vld [vmem:[%s2518_s1 + $0x294] sm:$0xf] }
  0x49   :  { %769 = vmatpush.bf16.msrb.mxu3 %v1133_v63  ;;  %v1664_v63 = vld [vmem:[%s2518_s1 + $0x1c4] sm:$0xf]  ;;  %v1285_v2 = vor.u32 %v1648_v58, %v1282_v59  ;;  %v1250_v46 = vld [vmem:[%s2518_s1 + $0x108] sm:$0xf0] }
  0x4a   :  { %743 = vmatpush.bf16.msrb.mxu1 %v1449_v8  ;;  %v1678_v8 = vld [vmem:[%s2518_s1 + $0x234] sm:$0xf]  ;;  %v1349_v10 = vor.u32 %v1664_v63, %v1346_v3  ;;  %v1640_v45 = vld [vmem:[%s2518_s1 + $0x104] sm:$0xf]  ;;  %v1314_v54 = vld [vmem:[%s2518_s1 + $0x188] sm:$0xf0] }
  0x4b   :  { %731 = vmatpush.bf16.msrb.mxu0 %v1377_v16  ;;  %v1466_v16 = vld [vmem:[%s2518_s1 + $0x2b8] sm:$0xf0]  ;;  %v1672_v47 = vld [vmem:[%s2518_s1 + $0x204] sm:$0xf]  ;;  %v1442_v58 = vld [vmem:[%s2518_s1 + $0x288] sm:$0xf0] }
  0x4c   :  { %782 = vmatpush.bf16.msra.mxu2 %v1197_v12  ;;  %v1662_v12 = vld [vmem:[%s2518_s1 + $0x1b4] sm:$0xf]  ;;  %v1469_v23 = vor.u32 %v1694_v15, %v1466_v16  ;;  %v1704_v59 = vld [vmem:[%s2518_s1 + $0x304] sm:$0xf]  ;;  %v1506_v60 = vld [vmem:[%s2518_s1 + $0x308] sm:$0xf0] }
  0x4d   :  { %770 = vmatpush.bf16.msrb.mxu3 %v1125_v17  ;;  %v1405_v17 = vor.u32 %v1678_v8, %v1402_v9  ;;  %v1713_v63 = vld [vmem:[#allocation2 + $0x38] sm:$0xff]  ;;  %v1711_v3 = vld [vmem:[#allocation2 + $0x28] sm:$0xff] }
  0x4e   :  { %744 = vmatpush.bf16.msrb.mxu1 %v1441_v26  ;;  %732 = vmatmul.bf16.vlgmr.msrb.gmra.mxu0 %v2323_v30  ;;  %v1330_v26 = vld [vmem:[%s2518_s1 + $0x1a8] sm:$0xf0] }
  0x4f   :  { %789 = vmatpush.bf16.msra.mxu0 %v1309_v21  ;;  %v1394_v21 = vld [vmem:[%s2518_s1 + $0x228] sm:$0xf0] }
  0x50   :  { %783 = vmatpush.bf16.msra.mxu2 %v1189_v31  ;;  %771 = vmatmul.bf16.vlgmr.msrb.gmra.mxu3 %v2114_v56  ;;  %v1474_v56 = vld [vmem:[%s2518_s1 + $0x2c8] sm:$0xf0]  ;;  %v1397_v29 = vor.u32 %v1676_v20, %v1394_v21  ;;  %v1642_v31 = vld [vmem:[%s2518_s1 + $0x114] sm:$0xf] }
  0x51   :  { %815 = vmatpush.bf16.msra.mxu3 %v1437_v22  ;;  %745 = vmatmul.bf16.vlgmr.msrb.gmra.mxu1 %v2334_v37  ;;  %v1477_v11 = vor.u32 %v1696_v4, %v1474_v56  ;;  %v1341_v22 = vor.u32 %v1662_v12, %v1338_v14  ;;  %v1261_v39 = vor.u32 %v1642_v31, %v1258_v32  ;;  %v1710_v4 = vld [vmem:[#allocation2 + $0x20] sm:$0xff]  ;;  %v1707_v56 = vld [vmem:[#allocation2 + $0x8] sm:$0xff] }
  0x52   :  { %802 = vmatpush.bf16.msra.mxu1 %v1373_v34  ;;  %v1386_v34 = vld [vmem:[%s2518_s1 + $0x218] sm:$0xf0] }
  0x53   :  { %790 = vmatpush.bf16.msra.mxu0 %v1301_v38  ;;  %784 = vmatmul.bf16.vlgmr.msra.gmra.mxu2 %v2133_v1  ;;  %v1357_v1 = vor.u32 %v1666_v50, %v1354_v53  ;;  %v1658_v38 = vld [vmem:[%s2518_s1 + $0x194] sm:$0xf]  ;;  %v1389_v44 = vor.u32 %v1674_v33, %v1386_v34  ;;  %v1656_v53 = vld [vmem:[%s2518_s1 + $0x184] sm:$0xf] }
  0x54   :  { %828 = vmatpush.bf16.msrb.mxu2 %v1501_v35  ;;  %v1333_v35 = vor.u32 %v1660_v24, %v1330_v26  ;;  %v1317_v61 = vor.u32 %v1656_v53, %v1314_v54  ;;  %v1719_v26 = vld [vmem:[#allocation2 + $0x68] sm:$0xff] }
  0x55   :  { %816 = vmatpush.bf16.msra.mxu3 %v1429_v42  ;;  %v1450_v42 = vld [vmem:[%s2518_s1 + $0x298] sm:$0xf0] }
  0x56   :  { %803 = vmatpush.bf16.msra.mxu1 %v1365_v48  ;;  %v1378_v48 = vld [vmem:[%s2518_s1 + $0x208] sm:$0xf0]  ;;  %v1453_v50 = vor.u32 %v1690_v41, %v1450_v42  ;;  %v1714_v41 = vld [vmem:[#allocation2 + $0x40] sm:$0xff] }
  0x57   :  { %791 = vmatpush.bf16.msra.mxu0 %v1293_v52  ;;  %v1253_v52 = vor.u32 %v1640_v45, %v1250_v46  ;;  %v1381_v55 = vor.u32 %v1672_v47, %v1378_v48 }
  0x58   :  { %829 = vmatpush.bf16.msrb.mxu2 %v1493_v49  ;;  %v1325_v49 = vor.u32 %v1658_v38, %v1322_v40  ;;  %v1715_v40 = vld [vmem:[#allocation2 + $0x48] sm:$0xff] }
  0x59   :  { %817 = vmatpush.bf16.msra.mxu3 %v1421_v57  ;;  %v1688_v57 = vld [vmem:[%s2518_s1 + $0x284] sm:$0xf] }
  0x5a   :  { %804 = vmatpush.bf16.msra.mxu1 %v1357_v1  ;;  %v1445_v1 = vor.u32 %v1688_v57, %v1442_v58 }
  0x5b   :  { %792 = vmatpush.bf16.msra.mxu0 %v1285_v2  ;;  %v1712_v2 = vld [vmem:[#allocation2 + $0x30] sm:$0xff] }
  0x5c   :  { %830 = vmatpush.bf16.msrb.mxu2 %v1485_v62  ;;  %v1509_v62 = vor.u32 %v1704_v59, %v1506_v60 }
  0x5d   :  { %818 = vmatpush.bf16.msra.mxu3 %v1413_v5 }
  0x5e   :  { %805 = vmatpush.bf16.msra.mxu1 %v1349_v10 }
  0x5f   :  { %793 = vmatpush.bf16.msra.mxu0 %v1277_v13 }
  0x60   :  { %831 = vmatpush.bf16.msrb.mxu2 %v1477_v11 }
  0x61   :  { %819 = vmatpush.bf16.msra.mxu3 %v1405_v17  ;;  %v1721_v17 = vld [vmem:[#allocation2 + $0x78] sm:$0xff] }
  0x62   :  { %806 = vmatpush.bf16.msra.mxu1 %v1341_v22  ;;  %v1720_v22 = vld [vmem:[#allocation2 + $0x70] sm:$0xff] }
  0x63   :  { %794 = vmatpush.bf16.msra.mxu0 %v1269_v25 }
  0x64   :  { %832 = vmatpush.bf16.msrb.mxu2 %v1469_v23 }
  0x65   :  { %820 = vmatpush.bf16.msra.mxu3 %v1397_v29  ;;  %v1718_v29 = vld [vmem:[#allocation2 + $0x60] sm:$0xff] }
  0x66   :  { %807 = vmatpush.bf16.msra.mxu1 %v1333_v35  ;;  %v1717_v35 = vld [vmem:[#allocation2 + $0x58] sm:$0xff] }
  0x67   :  { %795 = vmatpush.bf16.msra.mxu0 %v1261_v39 }
  0x68   :  { %833 = vmatpush.bf16.msrb.mxu2 %v1461_v36  ;;  %v1716_v36 = vld [vmem:[#allocation2 + $0x50] sm:$0xff] }
  0x69   :  { %821 = vmatpush.bf16.msra.mxu3 %v1389_v44 }
  0x6a   :  { %808 = vmatpush.bf16.msra.mxu1 %v1325_v49 }
  0x6b   :  { %796 = vmatpush.bf16.msra.mxu0 %v1253_v52 }
  0x6c   :  { %834 = vmatpush.bf16.msrb.mxu2 %v1453_v50 }
  0x6d   :  { %822 = vmatpush.bf16.msra.mxu3 %v1381_v55 }
  0x6e   :  { %809 = vmatpush.bf16.msra.mxu1 %v1317_v61  ;;  %797 = vmatmul.bf16.vlgmr.msra.gmra.mxu0 %v2106_v51  ;;  %v1709_v51 = vld [vmem:[#allocation2 + $0x18] sm:$0xff] }
  0x70   :  { %823 = vmatmul.bf16.vlgmr.msra.gmra.mxu3 %v2323_v30  ;;  %835 = vmatpush.bf16.msrb.mxu2 %v1445_v1  ;;  %v1708_v30 = vld [vmem:[#allocation2 + $0x10] sm:$0xff] }
  0x71   :  { %810 = vmatmul.bf16.vlgmr.msra.gmra.mxu1 %v2131_v0  ;;  %1003 = vmatpush.bf16.msrb.mxu3 %v1721_v17 }
  0x72   :  { %990 = vmatpush.bf16.msrb.mxu1 %v1713_v63 }
  0x73   :  { %836 = vmatmul.bf16.vlgmr.msrb.gmra.mxu2 %v2334_v37  ;;  %v1706_v37 = vld [vmem:[#allocation2] sm:$0xff] }
  0x74   :  { %848 = vmatpush.bf16.msra.mxu2 %v1509_v62 }
  0x75   :  { %1004 = vmatpush.bf16.msrb.mxu3 %v1720_v22 }
  0x76   :  { %991 = vmatpush.bf16.msrb.mxu1 %v1712_v2  ;;  %v1729_v2 = vld [vmem:[#allocation5 + $0x38] sm:$0xff] }
  0x77   :  { %1086 = vmatpush.bf16.msrb.mxu0 %v1729_v2 }
  0x79   :  { %1005 = vmatpush.bf16.msrb.mxu3 %v1719_v26 }
  0x7a   :  { %992 = vmatpush.bf16.msrb.mxu1 %v1711_v3  ;;  %v1728_v3 = vld [vmem:[#allocation5 + $0x30] sm:$0xff] }
  0x7b   :  { %1087 = vmatpush.bf16.msrb.mxu0 %v1728_v3 }
  0x7d   :  { %1006 = vmatpush.bf16.msrb.mxu3 %v1718_v29 }
  0x7e   :  { %993 = vmatpush.bf16.msrb.mxu1 %v1710_v4  ;;  %v1727_v4 = vld [vmem:[#allocation5 + $0x28] sm:$0xff] }
  0x7f   :  { %1088 = vmatpush.bf16.msrb.mxu0 %v1727_v4 }
  0x81   :  { %1007 = vmatpush.bf16.msrb.mxu3 %v1717_v35 }
  0x82   :  { %994 = vmatpush.bf16.msrb.mxu1 %v1709_v51  ;;  %v1726_v51 = vld [vmem:[#allocation5 + $0x20] sm:$0xff] }
  0x83   :  { %1511 = vmatmul.msk.bf16.vlgmr.msra.gmra.mxu2 %vm668_vm0, %v2223_v43  ;;  %v172_v43 = vld [vmem:[%s2519_s2] sm:$0x3]  ;;  %1089 = vmatpush.bf16.msrb.mxu0 %v1726_v51 }
  0x84   :  { %v174_v10 = vperm.slane %v172_v43, 0  ;;  %v175_v45 = vperm.slane %v172_v43, 1  ;;  %v1735_v43 = vld [vmem:[%s2521_s4] ss:$0 sm:$0xff] }
  0x85   :  { %1008 = vmatpush.bf16.msrb.mxu3 %v1716_v36 }
  0x86   :  { %995 = vmatpush.bf16.msrb.mxu1 %v1708_v30  ;;  %v1725_v30 = vld [vmem:[#allocation5 + $0x18] sm:$0xff] }
  0x87   :  { %1090 = vmatpush.bf16.msrb.mxu0 %v1725_v30 }
  0x89   :  { %1009 = vmatpush.bf16.msrb.mxu3 %v1715_v40 }
  0x8a   :  { %996 = vmatpush.bf16.msrb.mxu1 %v1707_v56  ;;  %v1724_v56 = vld [vmem:[#allocation5 + $0x10] sm:$0xff] }
  0x8b   :  { %1091 = vmatpush.bf16.msrb.mxu0 %v1724_v56 }
  0x8d   :  { %1010 = vmatpush.bf16.msrb.mxu3 %v1714_v41 }
  0x8e   :  { %997 = vmatpush.bf16.msrb.mxu1 %v1706_v37  ;;  %v1723_v37 = vld [vmem:[#allocation5 + $0x8] sm:$0xff] }
  0x8f   :  { %1092 = vmatpush.bf16.msrb.mxu0 %v1723_v37 }
  0xab   :  { %v681_v5 = vpop.f32.mrf.mxu0 }
  0xac   :  { %v682_v12 = vadd.f32 %v681_v5, %v174_v10 }
  0xae   :  { %v694_v0 = vpop.f32.mrf.mxu1 }
  0xaf   :  { %v695_v14 = vadd.f32 %v694_v0, %v682_v12 }
  0xb2   :  { %v707_v6 = vpop.f32.mrf.mxu2 }
  0xb3   :  { %v720_v7 = vpop.f32.mrf.mxu3  ;;  %v683_v8 = vpop.f32.mrf.mxu0  ;;  %v708_v16 = vadd.f32 %v707_v6, %v695_v14  ;;  %v1722_v6 = vld [vmem:[#allocation5] sm:$0xff] }
  0xb4   :  { %1093 = vmatpush.bf16.msrb.mxu0 %v1722_v6 }
  0xb5   :  { %v721_v18 = vadd.f32 %v720_v7, %v708_v16 }
  0xb6   :  { %v696_v9 = vpop.f32.mrf.mxu1 }
  0xba   :  { %v709_v11 = vpop.f32.mrf.mxu2 }
  0xbb   :  { %v722_v13 = vpop.f32.mrf.mxu3 }
  0xbc   :  { %v1736_v13 = vld [vmem:[%s2523_s6] ss:$0 sm:$0xff] }
  0xc2   :  { %v759_v15 = vpop.f32.mrf.mxu2 }
  0xca   :  { %v761_v21 = vpop.f32.mrf.mxu2 }
  0xcb   :  { %v733_v19 = vpop.f32.mrf.mxu0 }
  0xcc   :  { %v734_v20 = vadd.f32 %v733_v19, %v721_v18 }
  0xce   :  { %v746_v23 = vpop.f32.mrf.mxu1 }
  0xcf   :  { %v747_v24 = vadd.f32 %v746_v23, %v734_v20 }
  0xd1   :  { %v760_v25 = vadd.f32 %v759_v15, %v747_v24 }
  0xd3   :  { %v854_v27 = vmax.f32 %v760_v25, 0.0  ;;  %v735_v28 = vpop.f32.mrf.mxu0  ;;  %v772_v33 = vpop.f32.mrf.mxu3 }
  0xd4   :  { %v773_v48 = vadd.f32 %v772_v33, %v175_v45 }
  0xd5   :  { %v856_v31 = vpack.c.bf16 %v854_v27, %v854_v27 }
  0xd6   :  { %v785_v32 = vpop.f32.mrf.mxu2  ;;  %v748_v34 = vpop.f32.mrf.mxu1 }
  0xd7   :  { %998 = vmatmul.bf16.vlgmr.msrb.gmra.mxu1 %v856_v31  ;;  %v786_v52 = vadd.f32 %v785_v32, %v773_v48 }
  0xdb   :  { %v774_v39 = vpop.f32.mrf.mxu3 }
  0xde   :  { %v787_v38 = vpop.f32.mrf.mxu2 }
  0xeb   :  { %v798_v42 = vpop.f32.mrf.mxu0 }
  0xec   :  { %v799_v53 = vadd.f32 %v798_v42, %v786_v52 }
  0xee   :  { %v811_v44 = vpop.f32.mrf.mxu1 }
  0xef   :  { %v812_v57 = vadd.f32 %v811_v44, %v799_v53 }
  0xf3   :  { %v824_v46 = vpop.f32.mrf.mxu3  ;;  %v800_v47 = vpop.f32.mrf.mxu0 }
  0xf4   :  { %v825_v58 = vadd.f32 %v824_v46, %v812_v57 }
  0xf6   :  { %v837_v49 = vpop.f32.mrf.mxu2  ;;  %v813_v50 = vpop.f32.mrf.mxu1 }
  0xf7   :  { %v838_v59 = vadd.f32 %v837_v49, %v825_v58 }
  0xfb   :  { %v826_v54 = vpop.f32.mrf.mxu3 }
  0xfe   :  { %v839_v55 = vpop.f32.mrf.mxu2 }
 0x106   :  { %v850_v60 = vpop.f32.mrf.mxu2 }
 0x107   :  { %v851_v61 = vadd.f32 %v850_v60, %v838_v59 }
 0x109   :  { %v855_v1 = vmax.f32 %v851_v61, 0.0 }
 0x10b   :  { %v857_v62 = vpack.c.bf16 %v855_v1, %v855_v1 }
 0x10d   :  { %1011 = vmatmul.bf16.vlgmr.msrb.gmra.mxu3 %v857_v62 }
 0x10e   :  { %v852_v63 = vpop.f32.mrf.mxu2 }
 0x154   :  { %v999_v5 = vpop.f32.mrf.mxu1 }
 0x155   :  { %v1000_v7 = vadd.f32 %v1735_v43, %v999_v5 }
 0x15c   :  { %v1001_v0 = vpop.f32.mrf.mxu1 }
 0x190   :  { %v1012_v8 = vpop.f32.mrf.mxu3 }
 0x191   :  { %v1013_v9 = vadd.f32 %v1012_v8, %v1000_v7 }
 0x193   :  { %v1016_v10 = vmax.f32 %v1013_v9, 0.0 }
 0x195   :  { %v1017_v11 = vpack.c.bf16 %v1016_v10, %v1016_v10 }
 0x197   :  { %1094 = vmatmul.bf16.vlgmr.msrb.gmra.mxu0 %v1017_v11 }
 0x198   :  { %v1014_v12 = vpop.f32.mrf.mxu3 }
 0x214   :  { %v1095_v14 = vpop.f32.mrf.mxu0 }
 0x215   :  { %v1096_v15 = vadd.f32 %v1736_v13, %v1095_v14 }
 0x217   :  { %1099 = vst [vmem:[#allocation7] sm:$0xff] %v1096_v15 }
 0x218   :  { %1110 = dma.vmem_to_hbm [thread:$0]  %s1106_s17, 128, %s1108_s20, [#allocation4]  }
 0x21c   :  { %v1097_v16 = vpop.f32.mrf.mxu0 }
 0x21d   :  { %1813 = dma.done.wait [#allocation4], 128  }
 0x21e   :  { %1814 = vsyncadd [#allocation4], 4294967168 }
 0x21f   :  { %1115 = vsyncpa [#allocation3], 1 }
 0x220   :  { %1116 = vsyncpa [#allocation6], 1 }
 0x221   :  { %1117 = vsyncpa [#allocation4], 1 }

</bundles_post_ra>
